<compile_context>
chip_gen: v7x
topology: tpu7x:2x2x1
jax: 0.10.0
libtpu: 0.0.40
codegen_flags: <defaults>
</compile_context>

<pallas_src>
import jax
import jax.numpy as jnp
from jax.experimental import pallas as pl
from jax.experimental.pallas import tpu as pltpu


# ---------------------------------------------------------------------------
# Kernel 1: mapped = feature_transform(features)  as a flat blocked matmul.
# ---------------------------------------------------------------------------
def _feature_transform_kernel(x_ref, wft_ref, bft_ref, out_ref):
    # x_ref:   (TM, F)  flat (time*batch) rows -> big MXU M-dim
    # wft_ref: (F, A)   weight (constant index_map, stays resident)
    # bft_ref: (1, A)   bias, one broadcast+add per (TM, A) tile
    # out_ref: (TM, A)  lane-dense output block
    out_ref[...] = (
        jnp.dot(x_ref[...], wft_ref[...], preferred_element_type=jnp.float32)
        + bft_ref[...]
    ).astype(out_ref.dtype)


# ---------------------------------------------------------------------------
# Kernel 2: sum over time -> mean -> hidden / cell transforms.
# ---------------------------------------------------------------------------
def _mean_state_kernel(x_ref, norm_ref, wh_ref, bh_ref, wc_ref, bc_ref,
                       hid_ref, cell_ref, sum_ref):
    ti = pl.program_id(0)

    @pl.when(ti == 0)
    def _init():
        sum_ref[...] = jnp.zeros_like(sum_ref)

    # One (B, F) reduction per TT-timestep block (major-dim reduce, no relayout).
    sum_ref[...] += jnp.sum(x_ref[...].astype(jnp.float32), axis=0)

    @pl.when(ti == pl.num_programs(0) - 1)
    def _finalize():
        mean = sum_ref[...] / norm_ref[...]            # (B, F) / (B, 1)
        hid_ref[...] = (
            jnp.dot(mean, wh_ref[...], preferred_element_type=jnp.float32)
            + bh_ref[...]
        ).astype(hid_ref.dtype)
        cell_ref[...] = (
            jnp.dot(mean, wc_ref[...], preferred_element_type=jnp.float32)
            + bc_ref[...]
        ).astype(cell_ref.dtype)


# ---------------------------------------------------------------------------
# Tile-size selection against a conservative VMEM budget.
# ---------------------------------------------------------------------------
def _pick_block(dim, bytes_per_row, *, cap, budget_bytes):
    """Largest tile along `dim`: multiple of 8, <= cap, whose double-buffered
    footprint fits `budget_bytes`, preferring an exact divisor of `dim`."""
    fit = max(8, budget_bytes // max(2 * bytes_per_row, 1))
    tile = min(dim, cap, fit)
    if tile >= dim:
        return dim                      # full extent: always a legal block
    tile = max(8, (tile // 8) * 8)
    for t in range(tile, 7, -8):        # prefer a divisor (no ragged edge)
        if dim % t == 0:
            return t
    return tile                         # caller zero-pads up to a multiple


# ---------------------------------------------------------------------------
# Forward pass wrapper.
# ---------------------------------------------------------------------------
def p3d_encoder_forward(features_padded, features_actual_lengths, params):
    """features_padded: (T, B, F) f32; features_actual_lengths: (B,) float."""
    T, B, F = features_padded.shape
    wh, bh = params["wh"], params["bh"]
    wc, bc = params["wc"], params["bc"]
    H = wh.shape[1]
    norm = features_actual_lengths.astype(jnp.float32).reshape(B, 1)

    # ---------------- mapped_features = feature_transform(features) --------
    wft = params.get("wft")
    if wft is not None:
        bft = params["bft"]
        A = wft.shape[1]
        M = T * B
        # 6 MiB streaming budget for the (TM,F)+(TM,A) double buffers:
        # conservative vs v5e's 16 MiB default scoped VMEM and v7x's 64 MiB
        # physical VMEM, leaving room for the resident (F, A) weight block.
        tm = _pick_block(M, 4 * (F + A), cap=512, budget_bytes=6 << 20)
        x_flat = features_padded.reshape(M, F)        # free: contiguous view
        m_pad = (-M) % tm
        if m_pad:                                      # rare: no divisor tile
            x_flat = jnp.pad(x_flat, ((0, m_pad), (0, 0)))

        mapped_flat = pl.pallas_call(
            _feature_transform_kernel,
            out_shape=jax.ShapeDtypeStruct((M + m_pad, A), jnp.float32),
            grid_spec=pltpu.PrefetchScalarGridSpec(
                num_scalar_prefetch=0,
                grid=((M + m_pad) // tm,),
                in_specs=[
                    pl.BlockSpec((tm, F), lambda i: (i, 0)),   # activations
                    pl.BlockSpec((F, A), lambda i: (0, 0)),    # wft (resident)
                    pl.BlockSpec((1, A), lambda i: (0, 0)),    # bft
                ],
                out_specs=pl.BlockSpec((tm, A), lambda i: (i, 0)),
            ),
            compiler_params=pltpu.CompilerParams(
                # No carried state -> megacore / multi-TC friendly.
                dimension_semantics=("parallel",),
            ),
        )(x_flat, wft, bft.reshape(1, A))

        if m_pad:
            mapped_flat = mapped_flat[:M]
        # permute(1, 0, 2).contiguous(): single XLA transpose pass over T*B*A.
        mapped = jnp.transpose(mapped_flat.reshape(T, B, A), (1, 0, 2))
    else:
        # attention_size is None in the module -> mapped is just the permute.
        mapped = jnp.transpose(features_padded, (1, 0, 2))

    # ---------------- mean over time -> hidden / cell ----------------------
    tt = _pick_block(T, 4 * B * F, cap=64, budget_bytes=4 << 20)
    feats_sum = features_padded
    t_pad = (-T) % tt
    if t_pad:                            # zero rows do not change the sum
        feats_sum = jnp.pad(features_padded, ((0, t_pad), (0, 0), (0, 0)))

    hidden, cell = pl.pallas_call(
        _mean_state_kernel,
        out_shape=(
            jax.ShapeDtypeStruct((B, H), jnp.float32),
            jax.ShapeDtypeStruct((B, H), jnp.float32),
        ),
        grid_spec=pltpu.PrefetchScalarGridSpec(
            num_scalar_prefetch=0,
            grid=((T + t_pad) // tt,),
            in_specs=[
                pl.BlockSpec((tt, B, F), lambda i: (i, 0, 0)),  # time block
                pl.BlockSpec((B, 1), lambda i: (0, 0)),         # lengths
                pl.BlockSpec((F, H), lambda i: (0, 0)),         # wh
                pl.BlockSpec((1, H), lambda i: (0, 0)),         # bh
                pl.BlockSpec((F, H), lambda i: (0, 0)),         # wc
                pl.BlockSpec((1, H), lambda i: (0, 0)),         # bc
            ],
            out_specs=[
                pl.BlockSpec((B, H), lambda i: (0, 0)),  # hidden (last step)
                pl.BlockSpec((B, H), lambda i: (0, 0)),  # cell   (last step)
            ],
            scratch_shapes=[pltpu.VMEM((B, F), jnp.float32)],
        ),
        compiler_params=pltpu.CompilerParams(
            # Running-sum accumulator + last-step-only outputs: must stay
            # "arbitrary" (sequential) on this axis.
            dimension_semantics=("arbitrary",),
        ),
    )(feats_sum, norm, wh, bh.reshape(1, H), wc, bc.reshape(1, H))

    return mapped, (hidden, cell), None


# ---------------------------------------------------------------------------
# Params + pure-JAX reference.
# ---------------------------------------------------------------------------
def _init_params(key, feature_size, attention_size, hidden_size):
    k = jax.random.split(key, 6)
    s = 1.0 / jnp.sqrt(feature_size)
    # stored as (in, out) so kernels do x @ W directly
    return {
        "wft": jax.random.uniform(k[0], (feature_size, attention_size), jnp.float32, -s, s),
        "bft": jax.random.uniform(k[1], (attention_size,), jnp.float32, -s, s),
        "wh": jax.random.uniform(k[2], (feature_size, hidden_size), jnp.float32, -s, s),
        "bh": jax.random.uniform(k[3], (hidden_size,), jnp.float32, -s, s),
        "wc": jax.random.uniform(k[4], (feature_size, hidden_size), jnp.float32, -s, s),
        "bc": jax.random.uniform(k[5], (hidden_size,), jnp.float32, -s, s),
    }


def _reference_forward(features_padded, lengths, params):
    sum_features = jnp.sum(features_padded, axis=0)                    # (B, F)
    mean_features = sum_features / lengths.astype(jnp.float32).reshape(-1, 1)
    if params.get("wft") is not None:
        mapped = features_padded @ params["wft"] + params["bft"]       # (T, B, A)
    else:
        mapped = features_padded
    hidden = mean_features @ params["wh"] + params["bh"]
    cell = mean_features @ params["wc"] + params["bc"]
    return jnp.transpose(mapped, (1, 0, 2)), (hidden, cell), None


if __name__ == "__main__":
    # Small, lane/sublane-friendly shapes consistent with the module's forward.
    T, B = 256, 4
    feature_size, attention_size, hidden_size = 256, 128, 128

    key = jax.random.PRNGKey(0)
    k_x, k_p = jax.random.split(key)

    features_padded = jax.random.normal(k_x, (T, B, feature_size), jnp.float32)
    features_actual_lengths = jnp.array([256.0, 200.0, 128.0, 73.0], jnp.float32)
    params = _init_params(k_p, feature_size, attention_size, hidden_size)

    mapped, (hidden, cell), extra = p3d_encoder_forward(
        features_padded, features_actual_lengths, params
    )
    jax.block_until_ready((mapped, hidden, cell))

    mapped_ref, (hidden_ref, cell_ref), _ = _reference_forward(
        features_padded, features_actual_lengths, params
    )

    assert mapped.shape == (B, T, attention_size)
    assert hidden.shape == (B, hidden_size) and cell.shape == (B, hidden_size)
    assert extra is None
    # MXU-pass accumulation order differs slightly from the XLA reference.
    assert jnp.allclose(mapped, mapped_ref, atol=1e-3, rtol=1e-3)
    assert jnp.allclose(hidden, hidden_ref, atol=1e-3, rtol=1e-3)
    assert jnp.allclose(cell, cell_ref, atol=1e-3, rtol=1e-3)

    print("KERNEL_OK")
</pallas_src>

<mosaic_0001>
module attributes {stable_mosaic.version = 11 : i64} {
  func.func @_feature_transform_kernel(%arg0: i32, %arg1: memref<512x256xf32, #tpu.memory_space<vmem>>, %arg2: memref<256x128xf32, #tpu.memory_space<vmem>>, %arg3: memref<1x128xf32, #tpu.memory_space<vmem>>, %arg4: memref<512x128xf32, #tpu.memory_space<vmem>>) attributes {dimension_semantics = [#tpu.dimension_semantics<parallel>], iteration_bounds = array<i64: 2>, scalar_prefetch = 0 : i64, scratch_operands = 0 : i64, tpu.core_type = #tpu.core_type<tc>, window_params = [{transform_indices = @transform_0, window_bounds = array<i64: 512, 256>}, {pipeline_mode = #tpu.pipeline_mode<synchronous>, transform_indices = @transform_1, window_bounds = array<i64: 256, 128>}, {pipeline_mode = #tpu.pipeline_mode<synchronous>, transform_indices = @transform_2, window_bounds = array<i64: 1, 128>}, {transform_indices = @transform_3, window_bounds = array<i64: 512, 128>}]} {
    %c0 = arith.constant 0 : index
    %c0_0 = arith.constant 0 : index
    %0 = vector.load %arg1[%c0, %c0_0] : memref<512x256xf32, #tpu.memory_space<vmem>>, vector<512x256xf32>
    %c0_1 = arith.constant 0 : index
    %c0_2 = arith.constant 0 : index
    %1 = vector.load %arg2[%c0_1, %c0_2] : memref<256x128xf32, #tpu.memory_space<vmem>>, vector<256x128xf32>
    %cst = arith.constant dense<0.000000e+00> : vector<512x128xf32>
    %2 = tpu.matmul %0, %1, %cst {dimension_numbers = #tpu.dot_dimension_numbers<[1], [0], [0], [1], [0, 0, 1, 1], [], []>} : vector<512x256xf32>, vector<256x128xf32>, vector<512x128xf32> -> vector<512x128xf32>
    %c0_3 = arith.constant 0 : index
    %c0_4 = arith.constant 0 : index
    %3 = vector.load %arg3[%c0_3, %c0_4] : memref<1x128xf32, #tpu.memory_space<vmem>>, vector<1x128xf32>
    %4 = vector.broadcast %3 : vector<1x128xf32> to vector<512x128xf32>
    %5 = arith.addf %2, %4 : vector<512x128xf32>
    %c0_5 = arith.constant 0 : index
    %c0_6 = arith.constant 0 : index
    %6 = vector.load %arg4[%c0_5, %c0_6] : memref<512x128xf32, #tpu.memory_space<vmem>>, vector<512x128xf32>
    tpu.vector_store %arg4[%c0_5, %c0_6], %5 {strides = array<i32>} : memref<512x128xf32, #tpu.memory_space<vmem>>, vector<512x128xf32>,
    return
  }
  func.func @transform_0(%arg0: i32) -> (i32, i32) {
    %c0_i32 = arith.constant 0 : i32
    %c0_i32_0 = arith.constant 0 : i32
    return %arg0, %c0_i32 : i32, i32
  }
  func.func @transform_1(%arg0: i32) -> (i32, i32) {
    %c0_i32 = arith.constant 0 : i32
    %c0_i32_0 = arith.constant 0 : i32
    %c0_i32_1 = arith.constant 0 : i32
    return %c0_i32, %c0_i32_0 : i32, i32
  }
  func.func @transform_2(%arg0: i32) -> (i32, i32) {
    %c0_i32 = arith.constant 0 : i32
    %c0_i32_0 = arith.constant 0 : i32
    %c0_i32_1 = arith.constant 0 : i32
    return %c0_i32, %c0_i32_0 : i32, i32
  }
  func.func @transform_3(%arg0: i32) -> (i32, i32) {
    %c0_i32 = arith.constant 0 : i32
    %c0_i32_0 = arith.constant 0 : i32
    return %arg0, %c0_i32 : i32, i32
  }
}

</mosaic_0001>

<bundles_post_ra>
// kernel: tpu_custom_call.1
= control target key start
LH: loop header
LB: loop body
LE: loop exit
PB: predicated region body
PF: predicated region fallthrough
CT: control target
= control target key end

     0   :  { %8 = vsyncpa [#allocation3], 0  ;;  %s1745_s0 = inlined_call_operand.hbm [shape: f32[1024,256], index: 0, kind: input, shape index: {}]   ;;  %s1746_s1 = inlined_call_operand.hbm [shape: f32[256,128], index: 1, kind: input, shape index: {}]   ;;  %s1747_s2 = inlined_call_operand.vmem [shape: f32[1,128], index: 2, kind: input, shape index: {}]   ;;  %s1748_s3 = inlined_call_operand.hbm [shape: f32[1024,128], index: 3, kind: output, shape index: {}]  }
   0x1   :  { %10 = vsyncpa [#allocation3 + $0x1], 0 }
   0x2   :  { %11 = vsyncpa [#allocation6], 0 }
   0x3   :  { %12 = vsyncpa [#allocation4], 0 }
   0x4   :  { %14 = vsyncpa [#allocation4 + $0x1], 0  ;;  %s1245_s12 = smov 0   ;;  %s1247_s13 = smov 0  }
   0x5   :  { %s1249_s14 = smov 0   ;;  %s1251_s15 = smov 0  }
   0x6 LB: > { %s1266_s16 = sadd.s32 4294967295, %s1213_s15   ;;  %s920_s17 = sadd.s32 4294967294, %s1213_s15   ;;  %s1213_s15 = sphi %s1251_s15, %s1768_s15   ;;  %s1209_s14 = sphi %s1249_s14, %s1767_s14   ;;  %s1205_s13 = sphi %s1247_s13, %s1766_s13   ;;  %s1201_s12 = sphi %s1245_s12, %s1765_s12  }
   0x7   : > { %p40_p0 = scmp.ne.s32.totalorder %s1205_s13, %s1201_s12  ;;  %p1749_p1 = scmp.eq.s32.totalorder %s1266_s16, 0 }
   0x8   : > { %p112_p3 = scmp.eq.s32.totalorder %s920_s17, 1  ;;  %p921_p5 = scmp.ge.s32.totalorder %s1213_s15, 1 }
   0x9   : > { %p1275_p4 = por %p1749_p1, %p40_p0  ;;  %p119_p7 = scmp.lt.s32.totalorder %s1213_s15, 3 }
   0xa   : > { %p1280_p6 = por %p112_p3, %p40_p0  ;;  %s1215_s21 = smov [#allocation5]  }
   0xb   : > { %s1752_s18 = scalar_select %p1275_p4, 1, 0 }
   0xc   : > { %s1753_s19 = scalar_select %p1280_p6, 1, 0 }
   0xd   : > { %p1285_p8 = pnand %p921_p5, %p119_p7  ;;  %s131_s22 = sshll.u32 %s1215_s21, 4  ;;  %s1289_s22 = int_to_ptr.vmem [resolvable:$true] %s131_s22 }
   0xe   : > { %s1301_s24 = sadd.s32 1, %s1213_s15   ;;  %s27_s25 = sadd.s32 1, %s1209_s14 }
   0xf   : > { %s1754_s20 = scalar_select %p1285_p8, 1, 0 }
  0x10   : > { %p1029_p9 = pneg %p1285_p8  ;;  %s24_s26 = ssub.s32 %s1213_s15, %s1301_s24 }
  0x11   : > { %s1085_s29 = scalar_lea.hbm %s1746_s1, 4096 }
  0x12   : > { %p1296_p11 = pnand %p1029_p9, %p1749_p1  ;;  %p1086_p12 = scmp.ne.s32.totalorder %s1746_s1, %s1085_s29 }
  0x13   : > { %p1092_p5 = scmp.lt.u32.totalorder %s1085_s29, %s1746_s1 }
  0x14   : > { %p1087_p13 = pneg %p1296_p11 }
  0x16   : > { %p1088_p0 = pnand %p1087_p13, %p1086_p12 }
  0x18   : > { %p1089_p3 = pneg %p1088_p0 }
  0x1a   : > { %p1094_p7 = pnand %p1092_p5, %p1089_p3 }
  0x1c   : > { %1097 = shalt.err (!%p1094_p7)
}
  0x1d   : > { %s1098_s7 = scalar_lea.vmem %s1289_s22, 4096  ;;  %p1106_p2 = scmp.lt.s32.totalorder %s1289_s22, %s1289_s22 }
  0x1e   : > { %p1099_p9 = scmp.ne.s32.totalorder %s1289_s22, %s1098_s7  ;;  %p1107_p6 = scmp.lt.s32.totalorder %s1098_s7, %s1098_s7 }
  0x20   : > { %p1101_p10 = pnand %p1099_p9, %p1087_p13  ;;  %p1108_p4 = por %p1107_p6, %p1106_p2 }
  0x22   : > { %p1102_p1 = pneg %p1101_p10 }
  0x24   : > { %p1109_p8 = pnand %p1108_p4, %p1102_p1 }
  0x26   : > { %1112 = shalt.err (!%p1109_p8)
}
  0x27   : > { %s1216_s8 = smov 128   ;;  %s1217_s9 = smov 8  }
  0x28   : > { %1032 = dma.hbm_to_vmem [thread:$0]  (!%p1296_p11), %s1746_s1, 4096, %s1289_s22, [#allocation6], %s1216_s8, %s1216_s8, %s1217_s9  }
  0x29   : > { %p25_p2 = scmp.eq.s32.totalorder %s24_s26, 0  ;;  %p34_p1 = scmp.ne.s32.totalorder %s1209_s14, %s1205_s13 }
  0x2a   : > { %p35_p4 = scmp.eq.s32.totalorder %s1213_s15, 0  ;;  %p1042_p6 = scmp.lt.s32.totalorder %s1213_s15, 2 }
  0x2b   : > { %s1332_s17 = scalar_select %p25_p2, %s1209_s14, %s27_s25  }
  0x2c   : > { %p36_p8 = por %p35_p4, %p34_p1  ;;  %p1756_p10 = scmp.eq.s32.totalorder %s1266_s16, 1 }
  0x2d   : > { %s148_s27 = sand.u32 1, %s1209_s14   ;;  %s939_s28 = sshll.u32 %s1213_s15, 14 }
  0x2e   : > { %p1336_p12 = por %p1756_p10, %p34_p1  ;;  %s924_s29 = sshll.u32 %s148_s27, 10 }
  0x2f   : > { %s1345_s4 = scalar_lea.hbm %s1745_s0, %s939_s28  ;;  %s152_s22 = scalar_lea.vmem [#allocation2], %s924_s29 }
  0x30   : > { %s160_s25 = sshll.u32 %s152_s22, 4  ;;  %p1347_p11 = pnand %p1042_p6, %p36_p8  ;;  %s1351_s25 = int_to_ptr.vmem [resolvable:$true] %s160_s25 }
  0x31   : > { %s1353_s5 = scalar_lea.sflag [#allocation3], %s148_s27  ;;  %s1113_s6 = scalar_lea.hbm %s1345_s4, 16384 }
  0x32   : > { %p1114_p13 = scmp.ne.s32.totalorder %s1345_s4, %s1113_s6  ;;  %p1115_p0 = pneg %p1347_p11 }
  0x33   : > { %s1118_s9 = scalar_lea.hbm %s1745_s0, 32768  ;;  %p1119_p7 = scmp.lt.u32.totalorder %s1345_s4, %s1745_s0 }
  0x34   : > { %p1116_p3 = pnand %p1115_p0, %p1114_p13  ;;  %p1120_p9 = scmp.lt.u32.totalorder %s1118_s9, %s1113_s6 }
  0x35   : > { %p1122_p1 = scmp.lt.u32.totalorder %s1113_s6, %s1345_s4 }
  0x36   : > { %p1117_p5 = pneg %p1116_p3  ;;  %p1121_p2 = por %p1120_p9, %p1119_p7 }
  0x38   : > { %p1123_p4 = por %p1122_p1, %p1121_p2 }
  0x3a   : > { %p1124_p6 = pnand %p1123_p4, %p1117_p5 }
  0x3c   : > { %1127 = shalt.err (!%p1124_p6)
}
  0x3d   : > { %s1128_s27 = scalar_lea.vmem %s1351_s25, 16384  ;;  %s1218_s28 = smov [#allocation2]  }
  0x3e   : > { %p1129_p8 = scmp.ne.s32.totalorder %s1351_s25, %s1128_s27  ;;  %s1133_s29 = sshll.u32 %s1218_s28, 4  ;;  %s1134_s29 = int_to_ptr.vmem [resolvable:$false] %s1133_s29 }
  0x3f   : > { %s1135_s23 = scalar_lea.vmem %s1134_s29, 32768  ;;  %p1136_p3 = scmp.lt.s32.totalorder %s1351_s25, %s1134_s29 }
  0x40   : > { %p1131_p10 = pnand %p1129_p8, %p1115_p0  ;;  %p1137_p7 = scmp.lt.s32.totalorder %s1135_s23, %s1128_s27 }
  0x42   : > { %p1132_p13 = pneg %p1131_p10  ;;  %p1138_p9 = por %p1137_p7, %p1136_p3 }
  0x44   : > { %p1139_p2 = pnand %p1138_p9, %p1132_p13 }
  0x46   : > { %1142 = shalt.err (!%p1139_p2)
}
  0x47   : > { %s1219_s30 = smov 256   ;;  %s1220_s22 = smov 16  }
  0x48   : > { %1036 = dma.hbm_to_vmem [thread:$0]  (!%p1347_p11), %s1345_s4, 16384, %s1351_s25, %s1353_s5, %s1219_s30, %s1219_s30, %s1220_s22  }
  0x49   : > { %p1759_p0 = scmp.ne.s32.totalorder %s1754_s20, 0 }
  0x4a   : > { %s1384_s6 = sand.u32 (!%p1759_p0), 1, %s1205_s13   ;;  %p1760_p5 = scmp.ne.s32.totalorder (!%p1759_p0), %s1752_s18, 0 }
  0x4b   : > { %172 = sbr.rel (%p1759_p0) target bundleno = 505 (0x1f9), region = 32  ;;  %s929_s7 = sshll.u32 (!%p1759_p0), %s1384_s6, 10 }
  0x4c   : > { %s175_s8 = scalar_lea.sflag (!%p1759_p0), [#allocation3], %s1384_s6  ;;  %s1388_s9 = scalar_lea.vmem (!%p1759_p0), [#allocation2], %s929_s7 }
  0x52   : > { %1188 = dma.done.wait (%p1760_p5), %s175_s8, 16384  }
  0x53   : > { %1190 = vsyncadd (%p1760_p5), %s175_s8, 4294950912  ;;  %p1761_p11 = scmp.eq.s32.totalorder %s1266_s16, 0 }
  0x55   : > { %1192 = dma.done.wait (%p1761_p11), [#allocation6], 4096   ;;  %p1762_p1 = pmov %p1761_p11 }
  0x56   : > { %v1221_v0 = vmov 0.0|0.0   ;;  %v335_v1 = vld [vmem:[#allocation5] sm:$0xff]  ;;  %v336_v2 = vld [vmem:[#allocation5 + $0x8] sm:$0xff]  ;;  %v337_v3 = vld [vmem:[#allocation5 + $0x10] sm:$0xff]  ;;  %s931_s18 = sshll.u32 %s1384_s6, 9  ;;  %s940_s26 = sshll.u32 %s1266_s16, 13 }
  0x57   : > { %1194 = vsyncadd (%p1762_p1), [#allocation6], 4294963200  ;;  %941 = vmatprep.subr.bf16.mxu0 %v1221_v0  ;;  %989 = vmatprep.subr.bf16.mxu1 %v1221_v0  ;;  %v942_v4 = vpack.c.bf16 %v336_v2, %v335_v1  ;;  %v338_v5 = vld [vmem:[#allocation5 + $0x18] sm:$0xff]  ;;  %v339_v7 = vld [vmem:[#allocation5 + $0x20] sm:$0xff]  ;;  %s1566_s25 = scalar_lea.vmem [#allocation7], %s931_s18  ;;  %s1695_s27 = scalar_lea.hbm %s1748_s3, %s940_s26 }
  0x58   : > { %v945_v6 = vpack.c.bf16 %v338_v5, %v337_v3  ;;  %v340_v8 = vld [vmem:[#allocation5 + $0x28] sm:$0xff]  ;;  %v341_v10 = vld [vmem:[#allocation5 + $0x30] sm:$0xff]  ;;  %v342_v11 = vld [vmem:[#allocation5 + $0x38] sm:$0xff]  ;;  %s837_s5 = sshll.u32 %s1566_s25, 4  ;;  %s824_s16 = scalar_lea.sflag [#allocation4], %s1384_s6  ;;  %s1697_s5 = int_to_ptr.vmem [resolvable:$true] %s837_s5 }
  0x59   : > { %943 = vmatpush1.bf16.msra.mxu0 %v942_v4  ;;  %1005 = vmatpush1.bf16.msra.mxu1 %v942_v4  ;;  %v948_v9 = vpack.c.bf16 %v340_v8, %v339_v7  ;;  %v208_v12 = vld [vmem:[%s1388_s9 + $0x8] sm:$0xff]  ;;  %v951_v13 = vpack.c.bf16 %v342_v11, %v341_v10  ;;  %v343_v15 = vld [vmem:[#allocation5 + $0x40] sm:$0xff]  ;;  %v345_v18 = vld [vmem:[#allocation5 + $0x50] sm:$0xff]  ;;  %s1143_s28 = scalar_lea.vmem %s1697_s5, 8192  ;;  %s1222_s29 = smov [#allocation7]  }
  0x5a   : > { %944 = vmatprep.subr.bf16.mxu0 %v1221_v0  ;;  %990 = vmatprep.subr.bf16.mxu1 %v1221_v0  ;;  %v272_v14 = vld [vmem:[%s1388_s9 + $0x208] sm:$0xff]  ;;  %v346_v19 = vld [vmem:[#allocation5 + $0x58] sm:$0xff]  ;;  %v347_v21 = vld [vmem:[#allocation5 + $0x60] sm:$0xff]  ;;  %p1144_p4 = scmp.ne.s32.totalorder %s1697_s5, %s1143_s28  ;;  %s1147_s23 = sshll.u32 %s1222_s29, 4  ;;  %s1148_s23 = int_to_ptr.vmem [resolvable:$false] %s1147_s23 }
  0x5b   : > { %v344_v16 = vld [vmem:[#allocation5 + $0x48] sm:$0xff]  ;;  %438 = vmatprep.mubr.f32.mxu0 %v208_v12  ;;  %598 = vmatprep.mubr.f32.mxu1 %v272_v14  ;;  %v957_v20 = vpack.c.bf16 %v346_v19, %v345_v18  ;;  %v349_v24 = vld [vmem:[#allocation5 + $0x70] sm:$0xff]  ;;  %v350_v25 = vld [vmem:[#allocation5 + $0x78] sm:$0xff]  ;;  %s1149_s30 = scalar_lea.vmem %s1148_s23, 16384  ;;  %p1150_p10 = scmp.lt.s32.totalorder %s1697_s5, %s1148_s23 }
  0x5c   : > { %v954_v17 = vpack.c.bf16 %v344_v16, %v343_v15  ;;  %v348_v22 = vld [vmem:[#allocation5 + $0x68] sm:$0xff]  ;;  %v963_v26 = vpack.c.bf16 %v350_v25, %v349_v24  ;;  %v351_v27 = vld [vmem:[#allocation5 + $0x80] sm:$0xff]  ;;  %v353_v30 = vld [vmem:[#allocation5 + $0x90] sm:$0xff]  ;;  %p1145_p6 = pnand %p1144_p4, %p1336_p12  ;;  %p1151_p13 = scmp.lt.s32.totalorder %s1149_s30, %s1143_s28 }
  0x5d   : > { %946 = vmatpush1.bf16.msra.mxu0 %v945_v6  ;;  %1006 = vmatpush1.bf16.msra.mxu1 %v945_v6  ;;  %v960_v23 = vpack.c.bf16 %v348_v22, %v347_v21  ;;  %v352_v28 = vld [vmem:[#allocation5 + $0x88] sm:$0xff]  ;;  %v354_v31 = vld [vmem:[#allocation5 + $0x98] sm:$0xff]  ;;  %v355_v33 = vld [vmem:[#allocation5 + $0xa0] sm:$0xff] }
  0x5e   : > { %947 = vmatprep.subr.bf16.mxu0 %v1221_v0  ;;  %991 = vmatprep.subr.bf16.mxu1 %v1221_v0  ;;  %v966_v29 = vpack.c.bf16 %v352_v28, %v351_v27  ;;  %v969_v32 = vpack.c.bf16 %v354_v31, %v353_v30  ;;  %v356_v34 = vld [vmem:[#allocation5 + $0xa8] sm:$0xff]  ;;  %v357_v36 = vld [vmem:[#allocation5 + $0xb0] sm:$0xff]  ;;  %v358_v37 = vld [vmem:[#allocation5 + $0xb8] sm:$0xff]  ;;  %p1146_p8 = pneg %p1145_p6  ;;  %p1152_p3 = por %p1151_p13, %p1150_p10 }
  0x5f   : > { %v972_v35 = vpack.c.bf16 %v356_v34, %v355_v33  ;;  %v975_v38 = vpack.c.bf16 %v358_v37, %v357_v36  ;;  %v359_v39 = vld [vmem:[#allocation5 + $0xc0] sm:$0xff]  ;;  %v360_v40 = vld [vmem:[#allocation5 + $0xc8] sm:$0xff]  ;;  %v361_v42 = vld [vmem:[#allocation5 + $0xd0] sm:$0xff] }
  0x60   : > { %v978_v41 = vpack.c.bf16 %v360_v40, %v359_v39  ;;  %v362_v43 = vld [vmem:[#allocation5 + $0xd8] sm:$0xff]  ;;  %v363_v45 = vld [vmem:[#allocation5 + $0xe0] sm:$0xff]  ;;  %v364_v46 = vld [vmem:[#allocation5 + $0xe8] sm:$0xff]  ;;  %p1153_p7 = pnand %p1152_p3, %p1146_p8 }
  0x61   : > { %949 = vmatpush1.bf16.msra.mxu0 %v948_v9  ;;  %1007 = vmatpush1.bf16.msra.mxu1 %v948_v9  ;;  %v981_v44 = vpack.c.bf16 %v362_v43, %v361_v42  ;;  %v984_v47 = vpack.c.bf16 %v364_v46, %v363_v45  ;;  %v365_v48 = vld [vmem:[#allocation5 + $0xf0] sm:$0xff]  ;;  %v366_v49 = vld [vmem:[#allocation5 + $0xf8] sm:$0xff]  ;;  %v207_v51 = vld [vmem:[%s1388_s9] sm:$0xff] }
  0x62   : > { %950 = vmatprep.subr.bf16.mxu0 %v1221_v0  ;;  %992 = vmatprep.subr.bf16.mxu1 %v1221_v0  ;;  %v987_v50 = vpack.c.bf16 %v366_v49, %v365_v48  ;;  %v271_v52 = vld [vmem:[%s1388_s9 + $0x200] sm:$0xff]  ;;  %v210_v53 = vld [vmem:[%s1388_s9 + $0x18] sm:$0xff]  ;;  %v209_v55 = vld [vmem:[%s1388_s9 + $0x10] sm:$0xff] }
  0x63   : > { %v274_v54 = vld [vmem:[%s1388_s9 + $0x218] sm:$0xff]  ;;  %v273_v56 = vld [vmem:[%s1388_s9 + $0x210] sm:$0xff]  ;;  %v212_v57 = vld [vmem:[%s1388_s9 + $0x28] sm:$0xff] }
  0x64   : > { %v276_v58 = vld [vmem:[%s1388_s9 + $0x228] sm:$0xff]  ;;  %v211_v59 = vld [vmem:[%s1388_s9 + $0x20] sm:$0xff]  ;;  %v214_v61 = vld [vmem:[%s1388_s9 + $0x38] sm:$0xff] }
  0x65   : > { %952 = vmatpush1.bf16.msra.mxu0 %v951_v13  ;;  %1008 = vmatpush1.bf16.msra.mxu1 %v951_v13  ;;  %v275_v60 = vld [vmem:[%s1388_s9 + $0x220] sm:$0xff]  ;;  %v278_v62 = vld [vmem:[%s1388_s9 + $0x238] sm:$0xff]  ;;  %v213_v63 = vld [vmem:[%s1388_s9 + $0x30] sm:$0xff] }
  0x66   : > { %953 = vmatprep.subr.bf16.mxu0 %v1221_v0  ;;  %993 = vmatprep.subr.bf16.mxu1 %v1221_v0  ;;  %v216_v1 = vld [vmem:[%s1388_s9 + $0x48] sm:$0xff]  ;;  %v215_v3 = vld [vmem:[%s1388_s9 + $0x40] sm:$0xff]  ;;  %v218_v5 = vld [vmem:[%s1388_s9 + $0x58] sm:$0xff] }
  0x67   : > { %v280_v2 = vld [vmem:[%s1388_s9 + $0x248] sm:$0xff]  ;;  %v279_v4 = vld [vmem:[%s1388_s9 + $0x240] sm:$0xff]  ;;  %v282_v6 = vld [vmem:[%s1388_s9 + $0x258] sm:$0xff] }
  0x68   : > { %v217_v7 = vld [vmem:[%s1388_s9 + $0x50] sm:$0xff]  ;;  %v220_v9 = vld [vmem:[%s1388_s9 + $0x68] sm:$0xff]  ;;  %v219_v11 = vld [vmem:[%s1388_s9 + $0x60] sm:$0xff] }
  0x69   : > { %955 = vmatpush1.bf16.msra.mxu0 %v954_v17  ;;  %1009 = vmatpush1.bf16.msra.mxu1 %v954_v17  ;;  %v281_v8 = vld [vmem:[%s1388_s9 + $0x250] sm:$0xff]  ;;  %v284_v10 = vld [vmem:[%s1388_s9 + $0x268] sm:$0xff]  ;;  %v283_v12 = vld [vmem:[%s1388_s9 + $0x260] sm:$0xff] }
  0x6a   : > { %956 = vmatprep.subr.bf16.mxu0 %v1221_v0  ;;  %994 = vmatprep.subr.bf16.mxu1 %v1221_v0  ;;  %v222_v13 = vld [vmem:[%s1388_s9 + $0x78] sm:$0xff]  ;;  %v221_v15 = vld [vmem:[%s1388_s9 + $0x70] sm:$0xff]  ;;  %v224_v17 = vld [vmem:[%s1388_s9 + $0x88] sm:$0xff] }
  0x6b   : > { %v286_v14 = vld [vmem:[%s1388_s9 + $0x278] sm:$0xff]  ;;  %v285_v16 = vld [vmem:[%s1388_s9 + $0x270] sm:$0xff]  ;;  %v288_v18 = vld [vmem:[%s1388_s9 + $0x288] sm:$0xff] }
  0x6c   : > { %v223_v19 = vld [vmem:[%s1388_s9 + $0x80] sm:$0xff]  ;;  %v226_v21 = vld [vmem:[%s1388_s9 + $0x98] sm:$0xff]  ;;  %v289_v24 = vld [vmem:[%s1388_s9 + $0x290] sm:$0xff] }
  0x6d   : > { %958 = vmatpush1.bf16.msra.mxu0 %v957_v20  ;;  %1010 = vmatpush1.bf16.msra.mxu1 %v957_v20  ;;  %v287_v20 = vld [vmem:[%s1388_s9 + $0x280] sm:$0xff]  ;;  %v290_v22 = vld [vmem:[%s1388_s9 + $0x298] sm:$0xff]  ;;  %v228_v25 = vld [vmem:[%s1388_s9 + $0xa8] sm:$0xff] }
  0x6e   : > { %959 = vmatprep.subr.bf16.mxu0 %v1221_v0  ;;  %995 = vmatprep.subr.bf16.mxu1 %v1221_v0  ;;  %v227_v27 = vld [vmem:[%s1388_s9 + $0xa0] sm:$0xff]  ;;  %v294_v30 = vld [vmem:[%s1388_s9 + $0x2b8] sm:$0xff]  ;;  %v229_v31 = vld [vmem:[%s1388_s9 + $0xb0] sm:$0xff] }
  0x6f   : > { %v291_v28 = vld [vmem:[%s1388_s9 + $0x2a0] sm:$0xff]  ;;  %v232_v33 = vld [vmem:[%s1388_s9 + $0xc8] sm:$0xff]  ;;  %v234_v37 = vld [vmem:[%s1388_s9 + $0xd8] sm:$0xff] }
  0x70   : > { %v296_v34 = vld [vmem:[%s1388_s9 + $0x2c8] sm:$0xff]  ;;  %v295_v36 = vld [vmem:[%s1388_s9 + $0x2c0] sm:$0xff]  ;;  %v233_v39 = vld [vmem:[%s1388_s9 + $0xd0] sm:$0xff] }
  0x71   : > { %961 = vmatpush1.bf16.msra.mxu0 %v960_v23  ;;  %1011 = vmatpush1.bf16.msra.mxu1 %v960_v23  ;;  %v225_v23 = vld [vmem:[%s1388_s9 + $0x90] sm:$0xff]  ;;  %v300_v42 = vld [vmem:[%s1388_s9 + $0x2e8] sm:$0xff]  ;;  %v235_v43 = vld [vmem:[%s1388_s9 + $0xe0] sm:$0xff] }
  0x72   : > { %962 = vmatprep.subr.bf16.mxu0 %v1221_v0  ;;  %996 = vmatprep.subr.bf16.mxu1 %v1221_v0  ;;  %v297_v40 = vld [vmem:[%s1388_s9 + $0x2d0] sm:$0xff]  ;;  %v238_v45 = vld [vmem:[%s1388_s9 + $0xf8] sm:$0xff]  ;;  %v240_v49 = vld [vmem:[%s1388_s9 + $0x108] sm:$0xff] }
  0x73   : > { %v302_v46 = vld [vmem:[%s1388_s9 + $0x2f8] sm:$0xff]  ;;  %v301_v48 = vld [vmem:[%s1388_s9 + $0x2f0] sm:$0xff] }
  0x75   : > { %964 = vmatpush1.bf16.msra.mxu0 %v963_v26  ;;  %1012 = vmatpush1.bf16.msra.mxu1 %v963_v26  ;;  %v292_v26 = vld [vmem:[%s1388_s9 + $0x2a8] sm:$0xff] }
  0x76   : > { %965 = vmatprep.subr.bf16.mxu0 %v1221_v0  ;;  %997 = vmatprep.subr.bf16.mxu1 %v1221_v0 }
  0x79   : > { %967 = vmatpush1.bf16.msra.mxu0 %v966_v29  ;;  %1013 = vmatpush1.bf16.msra.mxu1 %v966_v29  ;;  %v230_v29 = vld [vmem:[%s1388_s9 + $0xb8] sm:$0xff] }
  0x7a   : > { %968 = vmatprep.subr.bf16.mxu0 %v1221_v0  ;;  %998 = vmatprep.subr.bf16.mxu1 %v1221_v0 }
  0x7d   : > { %970 = vmatpush1.bf16.msra.mxu0 %v969_v32  ;;  %1014 = vmatpush1.bf16.msra.mxu1 %v969_v32  ;;  %v293_v32 = vld [vmem:[%s1388_s9 + $0x2b0] sm:$0xff] }
  0x7e   : > { %971 = vmatprep.subr.bf16.mxu0 %v1221_v0  ;;  %999 = vmatprep.subr.bf16.mxu1 %v1221_v0 }
  0x81   : > { %973 = vmatpush1.bf16.msra.mxu0 %v972_v35  ;;  %1015 = vmatpush1.bf16.msra.mxu1 %v972_v35  ;;  %v231_v35 = vld [vmem:[%s1388_s9 + $0xc0] sm:$0xff] }
  0x82   : > { %974 = vmatprep.subr.bf16.mxu0 %v1221_v0  ;;  %1000 = vmatprep.subr.bf16.mxu1 %v1221_v0 }
  0x85   : > { %976 = vmatpush1.bf16.msra.mxu0 %v975_v38  ;;  %1016 = vmatpush1.bf16.msra.mxu1 %v975_v38  ;;  %v298_v38 = vld [vmem:[%s1388_s9 + $0x2d8] sm:$0xff] }
  0x86   : > { %977 = vmatprep.subr.bf16.mxu0 %v1221_v0  ;;  %1001 = vmatprep.subr.bf16.mxu1 %v1221_v0 }
  0x89   : > { %979 = vmatpush1.bf16.msra.mxu0 %v978_v41  ;;  %1017 = vmatpush1.bf16.msra.mxu1 %v978_v41  ;;  %v236_v41 = vld [vmem:[%s1388_s9 + $0xe8] sm:$0xff] }
  0x8a   : > { %980 = vmatprep.subr.bf16.mxu0 %v1221_v0  ;;  %1002 = vmatprep.subr.bf16.mxu1 %v1221_v0 }
  0x8d   : > { %982 = vmatpush1.bf16.msra.mxu0 %v981_v44  ;;  %1018 = vmatpush1.bf16.msra.mxu1 %v981_v44  ;;  %v299_v44 = vld [vmem:[%s1388_s9 + $0x2e0] sm:$0xff] }
  0x8e   : > { %983 = vmatprep.subr.bf16.mxu0 %v1221_v0  ;;  %1003 = vmatprep.subr.bf16.mxu1 %v1221_v0 }
  0x91   : > { %985 = vmatpush1.bf16.msra.mxu0 %v984_v47  ;;  %1019 = vmatpush1.bf16.msra.mxu1 %v984_v47  ;;  %v237_v47 = vld [vmem:[%s1388_s9 + $0xf0] sm:$0xff] }
  0x92   : > { %986 = vmatprep.subr.bf16.mxu0 %v1221_v0  ;;  %1004 = vmatprep.subr.bf16.mxu1 %v1221_v0  ;;  %v277_v0 = vld [vmem:[%s1388_s9 + $0x230] sm:$0xff] }
  0x95   : > { %988 = vmatpush1.bf16.msra.mxu0 %v987_v50  ;;  %1020 = vmatpush1.bf16.msra.mxu1 %v987_v50  ;;  %v304_v50 = vld [vmem:[%s1388_s9 + $0x308] sm:$0xff] }
  0x98   : > { %439 = vmatmul.mubr.f32.vlgmr.msra.gmra.mrb[0].mxu0 %v207_v51  ;;  %599 = vmatmul.mubr.f32.vlgmr.msra.gmra.mrb[0].mxu1 %v271_v52  ;;  %v239_v51 = vld [vmem:[%s1388_s9 + $0x100] sm:$0xff] }
  0x99   : > { %443 = vmatprep.mubr.f32.mxu0 %v210_v53  ;;  %603 = vmatprep.mubr.f32.mxu1 %v274_v54  ;;  %v303_v52 = vld [vmem:[%s1388_s9 + $0x300] sm:$0xff]  ;;  %v242_v53 = vld [vmem:[%s1388_s9 + $0x118] sm:$0xff] }
  0x9a   : > { %v306_v54 = vld [vmem:[%s1388_s9 + $0x318] sm:$0xff] }
  0x9c   : > { %444 = vmatmul.mubr.f32.gmra.mrb[2].mxu0 %v209_v55  ;;  %604 = vmatmul.mubr.f32.gmra.mrb[2].mxu1 %v273_v56  ;;  %v241_v55 = vld [vmem:[%s1388_s9 + $0x110] sm:$0xff] }
  0x9d   : > { %448 = vmatprep.mubr.f32.mxu0 %v212_v57  ;;  %608 = vmatprep.mubr.f32.mxu1 %v276_v58  ;;  %v305_v56 = vld [vmem:[%s1388_s9 + $0x310] sm:$0xff]  ;;  %v244_v57 = vld [vmem:[%s1388_s9 + $0x128] sm:$0xff] }
  0x9e   : > { %v308_v58 = vld [vmem:[%s1388_s9 + $0x328] sm:$0xff] }
  0xa0   : > { %449 = vmatmul.mubr.f32.gmra.mrb[4].mxu0 %v211_v59  ;;  %609 = vmatmul.mubr.f32.gmra.mrb[4].mxu1 %v275_v60  ;;  %v243_v59 = vld [vmem:[%s1388_s9 + $0x120] sm:$0xff] }
  0xa1   : > { %453 = vmatprep.mubr.f32.mxu0 %v214_v61  ;;  %613 = vmatprep.mubr.f32.mxu1 %v278_v62  ;;  %v307_v60 = vld [vmem:[%s1388_s9 + $0x320] sm:$0xff]  ;;  %v246_v61 = vld [vmem:[%s1388_s9 + $0x138] sm:$0xff] }
  0xa2   : > { %v310_v62 = vld [vmem:[%s1388_s9 + $0x338] sm:$0xff] }
  0xa4   : > { %454 = vmatmul.mubr.f32.gmra.mrb[6].mxu0 %v213_v63  ;;  %614 = vmatmul.mubr.f32.gmra.mrb[6].mxu1 %v277_v0  ;;  %v245_v63 = vld [vmem:[%s1388_s9 + $0x130] sm:$0xff] }
  0xa5   : > { %458 = vmatprep.mubr.f32.mxu0 %v216_v1  ;;  %618 = vmatprep.mubr.f32.mxu1 %v280_v2  ;;  %v309_v0 = vld [vmem:[%s1388_s9 + $0x330] sm:$0xff]  ;;  %v248_v1 = vld [vmem:[%s1388_s9 + $0x148] sm:$0xff] }
  0xa6   : > { %v312_v2 = vld [vmem:[%s1388_s9 + $0x348] sm:$0xff] }
  0xa8   : > { %459 = vmatmul.mubr.f32.gmra.mrb[8].mxu0 %v215_v3  ;;  %619 = vmatmul.mubr.f32.gmra.mrb[8].mxu1 %v279_v4  ;;  %v247_v3 = vld [vmem:[%s1388_s9 + $0x140] sm:$0xff] }
  0xa9   : > { %463 = vmatprep.mubr.f32.mxu0 %v218_v5  ;;  %623 = vmatprep.mubr.f32.mxu1 %v282_v6  ;;  %v311_v4 = vld [vmem:[%s1388_s9 + $0x340] sm:$0xff]  ;;  %v250_v5 = vld [vmem:[%s1388_s9 + $0x158] sm:$0xff] }
  0xaa   : > { %v314_v6 = vld [vmem:[%s1388_s9 + $0x358] sm:$0xff] }
  0xac   : > { %464 = vmatmul.mubr.f32.gmra.mrb[10].mxu0 %v217_v7  ;;  %624 = vmatmul.mubr.f32.gmra.mrb[10].mxu1 %v281_v8  ;;  %v249_v7 = vld [vmem:[%s1388_s9 + $0x150] sm:$0xff] }
  0xad   : > { %468 = vmatprep.mubr.f32.mxu0 %v220_v9  ;;  %628 = vmatprep.mubr.f32.mxu1 %v284_v10  ;;  %v313_v8 = vld [vmem:[%s1388_s9 + $0x350] sm:$0xff]  ;;  %v252_v9 = vld [vmem:[%s1388_s9 + $0x168] sm:$0xff] }
  0xae   : > { %v316_v10 = vld [vmem:[%s1388_s9 + $0x368] sm:$0xff] }
  0xb0   : > { %469 = vmatmul.mubr.f32.gmra.mrb[12].mxu0 %v219_v11  ;;  %629 = vmatmul.mubr.f32.gmra.mrb[12].mxu1 %v283_v12  ;;  %v251_v11 = vld [vmem:[%s1388_s9 + $0x160] sm:$0xff] }
  0xb1   : > { %473 = vmatprep.mubr.f32.mxu0 %v222_v13  ;;  %633 = vmatprep.mubr.f32.mxu1 %v286_v14  ;;  %v315_v12 = vld [vmem:[%s1388_s9 + $0x360] sm:$0xff]  ;;  %v254_v13 = vld [vmem:[%s1388_s9 + $0x178] sm:$0xff] }
  0xb2   : > { %v318_v14 = vld [vmem:[%s1388_s9 + $0x378] sm:$0xff] }
  0xb4   : > { %474 = vmatmul.mubr.f32.gmra.mrb[14].mxu0 %v221_v15  ;;  %634 = vmatmul.mubr.f32.gmra.mrb[14].mxu1 %v285_v16  ;;  %v253_v15 = vld [vmem:[%s1388_s9 + $0x170] sm:$0xff] }
  0xb5   : > { %478 = vmatprep.mubr.f32.mxu0 %v224_v17  ;;  %638 = vmatprep.mubr.f32.mxu1 %v288_v18  ;;  %v317_v16 = vld [vmem:[%s1388_s9 + $0x370] sm:$0xff]  ;;  %v256_v17 = vld [vmem:[%s1388_s9 + $0x188] sm:$0xff] }
  0xb6   : > { %v320_v18 = vld [vmem:[%s1388_s9 + $0x388] sm:$0xff] }
  0xb8   : > { %479 = vmatmul.mubr.f32.gmra.mrb[16].mxu0 %v223_v19  ;;  %639 = vmatmul.mubr.f32.gmra.mrb[16].mxu1 %v287_v20  ;;  %v255_v19 = vld [vmem:[%s1388_s9 + $0x180] sm:$0xff] }
  0xb9   : > { %483 = vmatprep.mubr.f32.mxu0 %v226_v21  ;;  %643 = vmatprep.mubr.f32.mxu1 %v290_v22  ;;  %v319_v20 = vld [vmem:[%s1388_s9 + $0x380] sm:$0xff]  ;;  %v258_v21 = vld [vmem:[%s1388_s9 + $0x198] sm:$0xff] }
  0xba   : > { %v322_v22 = vld [vmem:[%s1388_s9 + $0x398] sm:$0xff] }
  0xbc   : > { %484 = vmatmul.mubr.f32.gmra.mrb[18].mxu0 %v225_v23  ;;  %644 = vmatmul.mubr.f32.gmra.mrb[18].mxu1 %v289_v24  ;;  %v257_v23 = vld [vmem:[%s1388_s9 + $0x190] sm:$0xff] }
  0xbd   : > { %488 = vmatprep.mubr.f32.mxu0 %v228_v25  ;;  %648 = vmatprep.mubr.f32.mxu1 %v292_v26  ;;  %v321_v24 = vld [vmem:[%s1388_s9 + $0x390] sm:$0xff]  ;;  %v260_v25 = vld [vmem:[%s1388_s9 + $0x1a8] sm:$0xff] }
  0xbe   : > { %v324_v26 = vld [vmem:[%s1388_s9 + $0x3a8] sm:$0xff] }
  0xc0   : > { %489 = vmatmul.mubr.f32.gmra.mrb[20].mxu0 %v227_v27  ;;  %649 = vmatmul.mubr.f32.gmra.mrb[20].mxu1 %v291_v28  ;;  %v259_v27 = vld [vmem:[%s1388_s9 + $0x1a0] sm:$0xff] }
  0xc1   : > { %493 = vmatprep.mubr.f32.mxu0 %v230_v29  ;;  %653 = vmatprep.mubr.f32.mxu1 %v294_v30  ;;  %v323_v28 = vld [vmem:[%s1388_s9 + $0x3a0] sm:$0xff]  ;;  %v262_v29 = vld [vmem:[%s1388_s9 + $0x1b8] sm:$0xff] }
  0xc2   : > { %v326_v30 = vld [vmem:[%s1388_s9 + $0x3b8] sm:$0xff] }
  0xc4   : > { %494 = vmatmul.mubr.f32.gmra.mrb[22].mxu0 %v229_v31  ;;  %654 = vmatmul.mubr.f32.gmra.mrb[22].mxu1 %v293_v32  ;;  %v261_v31 = vld [vmem:[%s1388_s9 + $0x1b0] sm:$0xff] }
  0xc5   : > { %498 = vmatprep.mubr.f32.mxu0 %v232_v33  ;;  %658 = vmatprep.mubr.f32.mxu1 %v296_v34  ;;  %v325_v32 = vld [vmem:[%s1388_s9 + $0x3b0] sm:$0xff]  ;;  %v264_v33 = vld [vmem:[%s1388_s9 + $0x1c8] sm:$0xff] }
  0xc6   : > { %v328_v34 = vld [vmem:[%s1388_s9 + $0x3c8] sm:$0xff] }
  0xc8   : > { %499 = vmatmul.mubr.f32.gmra.mrb[24].mxu0 %v231_v35  ;;  %659 = vmatmul.mubr.f32.gmra.mrb[24].mxu1 %v295_v36  ;;  %v263_v35 = vld [vmem:[%s1388_s9 + $0x1c0] sm:$0xff] }
  0xc9   : > { %503 = vmatprep.mubr.f32.mxu0 %v234_v37  ;;  %663 = vmatprep.mubr.f32.mxu1 %v298_v38  ;;  %v327_v36 = vld [vmem:[%s1388_s9 + $0x3c0] sm:$0xff]  ;;  %v266_v37 = vld [vmem:[%s1388_s9 + $0x1d8] sm:$0xff] }
  0xca   : > { %v330_v38 = vld [vmem:[%s1388_s9 + $0x3d8] sm:$0xff] }
  0xcc   : > { %504 = vmatmul.mubr.f32.gmra.mrb[26].mxu0 %v233_v39  ;;  %664 = vmatmul.mubr.f32.gmra.mrb[26].mxu1 %v297_v40  ;;  %v265_v39 = vld [vmem:[%s1388_s9 + $0x1d0] sm:$0xff] }
  0xcd   : > { %508 = vmatprep.mubr.f32.mxu0 %v236_v41  ;;  %668 = vmatprep.mubr.f32.mxu1 %v300_v42  ;;  %v329_v40 = vld [vmem:[%s1388_s9 + $0x3d0] sm:$0xff]  ;;  %v268_v41 = vld [vmem:[%s1388_s9 + $0x1e8] sm:$0xff] }
  0xce   : > { %v332_v42 = vld [vmem:[%s1388_s9 + $0x3e8] sm:$0xff] }
  0xd0   : > { %509 = vmatmul.mubr.f32.gmra.mrb[28].mxu0 %v235_v43  ;;  %669 = vmatmul.mubr.f32.gmra.mrb[28].mxu1 %v299_v44  ;;  %v267_v43 = vld [vmem:[%s1388_s9 + $0x1e0] sm:$0xff] }
  0xd1   : > { %513 = vmatprep.mubr.f32.mxu0 %v238_v45  ;;  %673 = vmatprep.mubr.f32.mxu1 %v302_v46  ;;  %v331_v44 = vld [vmem:[%s1388_s9 + $0x3e0] sm:$0xff]  ;;  %v270_v45 = vld [vmem:[%s1388_s9 + $0x1f8] sm:$0xff] }
  0xd2   : > { %v334_v46 = vld [vmem:[%s1388_s9 + $0x3f8] sm:$0xff] }
  0xd4   : > { %514 = vmatmul.mubr.f32.gmra.mrb[30].mxu0 %v237_v47  ;;  %674 = vmatmul.mubr.f32.gmra.mrb[30].mxu1 %v301_v48  ;;  %v269_v47 = vld [vmem:[%s1388_s9 + $0x1f0] sm:$0xff] }
  0xd5   : > { %518 = vmatprep.mubr.f32.mxu0 %v240_v49  ;;  %678 = vmatprep.mubr.f32.mxu1 %v304_v50  ;;  %v333_v48 = vld [vmem:[%s1388_s9 + $0x3f0] sm:$0xff]  ;;  %v1562_v49 = vld [vmem:[%s1747_s2] ss:$0 sm:$0xff] }
  0xd8   : > { %519 = vmatmul.mubr.f32.gmra.mrb[32].mxu0 %v239_v51  ;;  %679 = vmatmul.mubr.f32.gmra.mrb[32].mxu1 %v303_v52 }
  0xd9   : > { %523 = vmatprep.mubr.f32.mxu0 %v242_v53  ;;  %683 = vmatprep.mubr.f32.mxu1 %v306_v54 }
  0xdc   : > { %524 = vmatmul.mubr.f32.gmra.mrb[34].mxu0 %v241_v55  ;;  %684 = vmatmul.mubr.f32.gmra.mrb[34].mxu1 %v305_v56 }
  0xdd   : > { %528 = vmatprep.mubr.f32.mxu0 %v244_v57  ;;  %688 = vmatprep.mubr.f32.mxu1 %v308_v58 }
  0xe0   : > { %529 = vmatmul.mubr.f32.gmra.mrb[36].mxu0 %v243_v59  ;;  %689 = vmatmul.mubr.f32.gmra.mrb[36].mxu1 %v307_v60 }
  0xe1   : > { %533 = vmatprep.mubr.f32.mxu0 %v246_v61  ;;  %693 = vmatprep.mubr.f32.mxu1 %v310_v62 }
  0xe4   : > { %534 = vmatmul.mubr.f32.gmra.mrb[38].mxu0 %v245_v63  ;;  %694 = vmatmul.mubr.f32.gmra.mrb[38].mxu1 %v309_v0 }
  0xe5   : > { %538 = vmatprep.mubr.f32.mxu0 %v248_v1  ;;  %698 = vmatprep.mubr.f32.mxu1 %v312_v2 }
  0xe8   : > { %539 = vmatmul.mubr.f32.gmra.mrb[40].mxu0 %v247_v3  ;;  %699 = vmatmul.mubr.f32.gmra.mrb[40].mxu1 %v311_v4 }
  0xe9   : > { %543 = vmatprep.mubr.f32.mxu0 %v250_v5  ;;  %703 = vmatprep.mubr.f32.mxu1 %v314_v6 }
  0xec   : > { %544 = vmatmul.mubr.f32.gmra.mrb[42].mxu0 %v249_v7  ;;  %704 = vmatmul.mubr.f32.gmra.mrb[42].mxu1 %v313_v8 }
  0xed   : > { %548 = vmatprep.mubr.f32.mxu0 %v252_v9  ;;  %708 = vmatprep.mubr.f32.mxu1 %v316_v10 }
  0xf0   : > { %549 = vmatmul.mubr.f32.gmra.mrb[44].mxu0 %v251_v11  ;;  %709 = vmatmul.mubr.f32.gmra.mrb[44].mxu1 %v315_v12 }
  0xf1   : > { %553 = vmatprep.mubr.f32.mxu0 %v254_v13  ;;  %713 = vmatprep.mubr.f32.mxu1 %v318_v14 }
  0xf4   : > { %554 = vmatmul.mubr.f32.gmra.mrb[46].mxu0 %v253_v15  ;;  %714 = vmatmul.mubr.f32.gmra.mrb[46].mxu1 %v317_v16 }
  0xf5   : > { %558 = vmatprep.mubr.f32.mxu0 %v256_v17  ;;  %718 = vmatprep.mubr.f32.mxu1 %v320_v18 }
  0xf8   : > { %559 = vmatmul.mubr.f32.gmra.mrb[48].mxu0 %v255_v19  ;;  %719 = vmatmul.mubr.f32.gmra.mrb[48].mxu1 %v319_v20 }
  0xf9   : > { %563 = vmatprep.mubr.f32.mxu0 %v258_v21  ;;  %723 = vmatprep.mubr.f32.mxu1 %v322_v22 }
  0xfc   : > { %564 = vmatmul.mubr.f32.gmra.mrb[50].mxu0 %v257_v23  ;;  %724 = vmatmul.mubr.f32.gmra.mrb[50].mxu1 %v321_v24 }
  0xfd   : > { %568 = vmatprep.mubr.f32.mxu0 %v260_v25  ;;  %728 = vmatprep.mubr.f32.mxu1 %v324_v26 }
 0x100   : > { %569 = vmatmul.mubr.f32.gmra.mrb[52].mxu0 %v259_v27  ;;  %729 = vmatmul.mubr.f32.gmra.mrb[52].mxu1 %v323_v28 }
 0x101   : > { %573 = vmatprep.mubr.f32.mxu0 %v262_v29  ;;  %733 = vmatprep.mubr.f32.mxu1 %v326_v30 }
 0x104   : > { %574 = vmatmul.mubr.f32.gmra.mrb[54].mxu0 %v261_v31  ;;  %734 = vmatmul.mubr.f32.gmra.mrb[54].mxu1 %v325_v32 }
 0x105   : > { %578 = vmatprep.mubr.f32.mxu0 %v264_v33  ;;  %738 = vmatprep.mubr.f32.mxu1 %v328_v34 }
 0x108   : > { %579 = vmatmul.mubr.f32.gmra.mrb[56].mxu0 %v263_v35  ;;  %739 = vmatmul.mubr.f32.gmra.mrb[56].mxu1 %v327_v36 }
 0x109   : > { %583 = vmatprep.mubr.f32.mxu0 %v266_v37  ;;  %743 = vmatprep.mubr.f32.mxu1 %v330_v38 }
 0x10c   : > { %584 = vmatmul.mubr.f32.gmra.mrb[58].mxu0 %v265_v39  ;;  %744 = vmatmul.mubr.f32.gmra.mrb[58].mxu1 %v329_v40 }
 0x10d   : > { %588 = vmatprep.mubr.f32.mxu0 %v268_v41  ;;  %748 = vmatprep.mubr.f32.mxu1 %v332_v42 }
 0x110   : > { %589 = vmatmul.mubr.f32.gmra.mrb[60].mxu0 %v267_v43  ;;  %749 = vmatmul.mubr.f32.gmra.mrb[60].mxu1 %v331_v44 }
 0x111   : > { %593 = vmatprep.mubr.f32.mxu0 %v270_v45  ;;  %753 = vmatprep.mubr.f32.mxu1 %v334_v46 }
 0x114   : > { %594 = vmatmul.mubr.f32.gmra.mrb[62].mxu0 %v269_v47  ;;  %754 = vmatmul.mubr.f32.gmra.mrb[62].mxu1 %v333_v48 }
 0x16b   : > { %v440_v50 = vpop.f32.mrb[0].mxu0  ;;  %v600_v51 = vpop.f32.mrb[0].mxu1 }
 0x16c   : > { %v441_v52 = vadd.f32 %v1562_v49, %v440_v50  ;;  %v601_v53 = vadd.f32 %v1562_v49, %v600_v51  ;;  %v442_v54 = vpop.f32.mrb[1].mxu0  ;;  %v602_v55 = vpop.f32.mrb[1].mxu1 }
 0x16e   : > { %759 = vst [vmem:[%s1566_s25] sm:$0xff] %v441_v52  ;;  %791 = vst [vmem:[%s1566_s25 + $0x100] sm:$0xff] %v601_v53 }
 0x16f   : > { %v445_v56 = vpop.f32.mrb[2].mxu0  ;;  %v605_v57 = vpop.f32.mrb[2].mxu1 }
 0x170   : > { %v446_v58 = vadd.f32 %v1562_v49, %v445_v56  ;;  %v606_v59 = vadd.f32 %v1562_v49, %v605_v57  ;;  %v447_v60 = vpop.f32.mrb[3].mxu0  ;;  %v607_v61 = vpop.f32.mrb[3].mxu1 }
 0x172   : > { %760 = vst [vmem:[%s1566_s25 + $0x8] sm:$0xff] %v446_v58  ;;  %792 = vst [vmem:[%s1566_s25 + $0x108] sm:$0xff] %v606_v59 }
 0x173   : > { %v450_v62 = vpop.f32.mrb[4].mxu0  ;;  %v610_v63 = vpop.f32.mrb[4].mxu1 }
 0x174   : > { %v451_v0 = vadd.f32 %v1562_v49, %v450_v62  ;;  %v611_v1 = vadd.f32 %v1562_v49, %v610_v63  ;;  %v452_v2 = vpop.f32.mrb[5].mxu0  ;;  %v612_v3 = vpop.f32.mrb[5].mxu1 }
 0x176   : > { %761 = vst [vmem:[%s1566_s25 + $0x10] sm:$0xff] %v451_v0  ;;  %793 = vst [vmem:[%s1566_s25 + $0x110] sm:$0xff] %v611_v1 }
 0x177   : > { %v455_v4 = vpop.f32.mrb[6].mxu0  ;;  %v615_v5 = vpop.f32.mrb[6].mxu1 }
 0x178   : > { %v456_v6 = vadd.f32 %v1562_v49, %v455_v4  ;;  %v616_v7 = vadd.f32 %v1562_v49, %v615_v5  ;;  %v457_v8 = vpop.f32.mrb[7].mxu0  ;;  %v617_v9 = vpop.f32.mrb[7].mxu1 }
 0x17a   : > { %762 = vst [vmem:[%s1566_s25 + $0x18] sm:$0xff] %v456_v6  ;;  %794 = vst [vmem:[%s1566_s25 + $0x118] sm:$0xff] %v616_v7 }
 0x17b   : > { %v460_v10 = vpop.f32.mrb[8].mxu0  ;;  %v620_v11 = vpop.f32.mrb[8].mxu1 }
 0x17c   : > { %v461_v12 = vadd.f32 %v1562_v49, %v460_v10  ;;  %v621_v13 = vadd.f32 %v1562_v49, %v620_v11  ;;  %v462_v14 = vpop.f32.mrb[9].mxu0  ;;  %v622_v15 = vpop.f32.mrb[9].mxu1 }
 0x17e   : > { %763 = vst [vmem:[%s1566_s25 + $0x20] sm:$0xff] %v461_v12  ;;  %795 = vst [vmem:[%s1566_s25 + $0x120] sm:$0xff] %v621_v13 }
 0x17f   : > { %v465_v16 = vpop.f32.mrb[10].mxu0  ;;  %v625_v17 = vpop.f32.mrb[10].mxu1 }
 0x180   : > { %v466_v18 = vadd.f32 %v1562_v49, %v465_v16  ;;  %v626_v19 = vadd.f32 %v1562_v49, %v625_v17  ;;  %v467_v20 = vpop.f32.mrb[11].mxu0  ;;  %v627_v21 = vpop.f32.mrb[11].mxu1 }
 0x182   : > { %764 = vst [vmem:[%s1566_s25 + $0x28] sm:$0xff] %v466_v18  ;;  %796 = vst [vmem:[%s1566_s25 + $0x128] sm:$0xff] %v626_v19 }
 0x183   : > { %v470_v22 = vpop.f32.mrb[12].mxu0  ;;  %v630_v23 = vpop.f32.mrb[12].mxu1 }
 0x184   : > { %v471_v24 = vadd.f32 %v1562_v49, %v470_v22  ;;  %v631_v25 = vadd.f32 %v1562_v49, %v630_v23  ;;  %v472_v26 = vpop.f32.mrb[13].mxu0  ;;  %v632_v27 = vpop.f32.mrb[13].mxu1 }
 0x186   : > { %765 = vst [vmem:[%s1566_s25 + $0x30] sm:$0xff] %v471_v24  ;;  %797 = vst [vmem:[%s1566_s25 + $0x130] sm:$0xff] %v631_v25 }
 0x187   : > { %v475_v28 = vpop.f32.mrb[14].mxu0  ;;  %v635_v29 = vpop.f32.mrb[14].mxu1 }
 0x188   : > { %v476_v30 = vadd.f32 %v1562_v49, %v475_v28  ;;  %v636_v31 = vadd.f32 %v1562_v49, %v635_v29  ;;  %v477_v32 = vpop.f32.mrb[15].mxu0  ;;  %v637_v33 = vpop.f32.mrb[15].mxu1 }
 0x18a   : > { %766 = vst [vmem:[%s1566_s25 + $0x38] sm:$0xff] %v476_v30  ;;  %798 = vst [vmem:[%s1566_s25 + $0x138] sm:$0xff] %v636_v31 }
 0x18b   : > { %v480_v34 = vpop.f32.mrb[16].mxu0  ;;  %v640_v35 = vpop.f32.mrb[16].mxu1 }
 0x18c   : > { %v481_v36 = vadd.f32 %v1562_v49, %v480_v34  ;;  %v641_v37 = vadd.f32 %v1562_v49, %v640_v35  ;;  %v482_v38 = vpop.f32.mrb[17].mxu0  ;;  %v642_v39 = vpop.f32.mrb[17].mxu1 }
 0x18e   : > { %767 = vst [vmem:[%s1566_s25 + $0x40] sm:$0xff] %v481_v36  ;;  %799 = vst [vmem:[%s1566_s25 + $0x140] sm:$0xff] %v641_v37 }
 0x18f   : > { %v485_v40 = vpop.f32.mrb[18].mxu0  ;;  %v645_v41 = vpop.f32.mrb[18].mxu1 }
 0x190   : > { %v486_v42 = vadd.f32 %v1562_v49, %v485_v40  ;;  %v646_v43 = vadd.f32 %v1562_v49, %v645_v41  ;;  %v487_v44 = vpop.f32.mrb[19].mxu0  ;;  %v647_v45 = vpop.f32.mrb[19].mxu1 }
 0x192   : > { %768 = vst [vmem:[%s1566_s25 + $0x48] sm:$0xff] %v486_v42  ;;  %800 = vst [vmem:[%s1566_s25 + $0x148] sm:$0xff] %v646_v43 }
 0x193   : > { %v490_v46 = vpop.f32.mrb[20].mxu0  ;;  %v650_v47 = vpop.f32.mrb[20].mxu1 }
 0x194   : > { %v491_v48 = vadd.f32 %v1562_v49, %v490_v46  ;;  %v651_v50 = vadd.f32 %v1562_v49, %v650_v47  ;;  %v492_v51 = vpop.f32.mrb[21].mxu0  ;;  %v652_v52 = vpop.f32.mrb[21].mxu1 }
 0x196   : > { %769 = vst [vmem:[%s1566_s25 + $0x50] sm:$0xff] %v491_v48  ;;  %801 = vst [vmem:[%s1566_s25 + $0x150] sm:$0xff] %v651_v50 }
 0x197   : > { %v495_v53 = vpop.f32.mrb[22].mxu0  ;;  %v655_v54 = vpop.f32.mrb[22].mxu1 }
 0x198   : > { %v496_v55 = vadd.f32 %v1562_v49, %v495_v53  ;;  %v656_v56 = vadd.f32 %v1562_v49, %v655_v54  ;;  %v497_v57 = vpop.f32.mrb[23].mxu0  ;;  %v657_v58 = vpop.f32.mrb[23].mxu1 }
 0x19a   : > { %770 = vst [vmem:[%s1566_s25 + $0x58] sm:$0xff] %v496_v55  ;;  %802 = vst [vmem:[%s1566_s25 + $0x158] sm:$0xff] %v656_v56 }
 0x19b   : > { %v500_v59 = vpop.f32.mrb[24].mxu0  ;;  %v660_v60 = vpop.f32.mrb[24].mxu1 }
 0x19c   : > { %v501_v61 = vadd.f32 %v1562_v49, %v500_v59  ;;  %v661_v62 = vadd.f32 %v1562_v49, %v660_v60  ;;  %v502_v63 = vpop.f32.mrb[25].mxu0  ;;  %v662_v0 = vpop.f32.mrb[25].mxu1 }
 0x19e   : > { %771 = vst [vmem:[%s1566_s25 + $0x60] sm:$0xff] %v501_v61  ;;  %803 = vst [vmem:[%s1566_s25 + $0x160] sm:$0xff] %v661_v62 }
 0x19f   : > { %v505_v1 = vpop.f32.mrb[26].mxu0  ;;  %v665_v2 = vpop.f32.mrb[26].mxu1 }
 0x1a0   : > { %v506_v3 = vadd.f32 %v1562_v49, %v505_v1  ;;  %v666_v4 = vadd.f32 %v1562_v49, %v665_v2  ;;  %v507_v5 = vpop.f32.mrb[27].mxu0  ;;  %v667_v6 = vpop.f32.mrb[27].mxu1 }
 0x1a2   : > { %772 = vst [vmem:[%s1566_s25 + $0x68] sm:$0xff] %v506_v3  ;;  %804 = vst [vmem:[%s1566_s25 + $0x168] sm:$0xff] %v666_v4 }
 0x1a3   : > { %v510_v7 = vpop.f32.mrb[28].mxu0  ;;  %v670_v8 = vpop.f32.mrb[28].mxu1 }
 0x1a4   : > { %v511_v9 = vadd.f32 %v1562_v49, %v510_v7  ;;  %v671_v10 = vadd.f32 %v1562_v49, %v670_v8  ;;  %v512_v11 = vpop.f32.mrb[29].mxu0  ;;  %v672_v12 = vpop.f32.mrb[29].mxu1 }
 0x1a6   : > { %773 = vst [vmem:[%s1566_s25 + $0x70] sm:$0xff] %v511_v9  ;;  %805 = vst [vmem:[%s1566_s25 + $0x170] sm:$0xff] %v671_v10 }
 0x1a7   : > { %v515_v13 = vpop.f32.mrb[30].mxu0  ;;  %v675_v14 = vpop.f32.mrb[30].mxu1 }
 0x1a8   : > { %v516_v15 = vadd.f32 %v1562_v49, %v515_v13  ;;  %v676_v16 = vadd.f32 %v1562_v49, %v675_v14  ;;  %v517_v17 = vpop.f32.mrb[31].mxu0  ;;  %v677_v18 = vpop.f32.mrb[31].mxu1 }
 0x1aa   : > { %774 = vst [vmem:[%s1566_s25 + $0x78] sm:$0xff] %v516_v15  ;;  %806 = vst [vmem:[%s1566_s25 + $0x178] sm:$0xff] %v676_v16 }
 0x1ab   : > { %v520_v19 = vpop.f32.mrb[32].mxu0  ;;  %v680_v20 = vpop.f32.mrb[32].mxu1 }
 0x1ac   : > { %v521_v21 = vadd.f32 %v1562_v49, %v520_v19  ;;  %v681_v22 = vadd.f32 %v1562_v49, %v680_v20  ;;  %v522_v23 = vpop.f32.mrb[33].mxu0  ;;  %v682_v24 = vpop.f32.mrb[33].mxu1 }
 0x1ae   : > { %775 = vst [vmem:[%s1566_s25 + $0x80] sm:$0xff] %v521_v21  ;;  %807 = vst [vmem:[%s1566_s25 + $0x180] sm:$0xff] %v681_v22 }
 0x1af   : > { %v525_v25 = vpop.f32.mrb[34].mxu0  ;;  %v685_v26 = vpop.f32.mrb[34].mxu1 }
 0x1b0   : > { %v526_v27 = vadd.f32 %v1562_v49, %v525_v25  ;;  %v686_v28 = vadd.f32 %v1562_v49, %v685_v26  ;;  %v527_v29 = vpop.f32.mrb[35].mxu0  ;;  %v687_v30 = vpop.f32.mrb[35].mxu1 }
 0x1b2   : > { %776 = vst [vmem:[%s1566_s25 + $0x88] sm:$0xff] %v526_v27  ;;  %808 = vst [vmem:[%s1566_s25 + $0x188] sm:$0xff] %v686_v28 }
 0x1b3   : > { %v530_v31 = vpop.f32.mrb[36].mxu0  ;;  %v690_v32 = vpop.f32.mrb[36].mxu1 }
 0x1b4   : > { %v531_v33 = vadd.f32 %v1562_v49, %v530_v31  ;;  %v691_v34 = vadd.f32 %v1562_v49, %v690_v32  ;;  %v532_v35 = vpop.f32.mrb[37].mxu0  ;;  %v692_v36 = vpop.f32.mrb[37].mxu1 }
 0x1b6   : > { %777 = vst [vmem:[%s1566_s25 + $0x90] sm:$0xff] %v531_v33  ;;  %809 = vst [vmem:[%s1566_s25 + $0x190] sm:$0xff] %v691_v34 }
 0x1b7   : > { %v535_v37 = vpop.f32.mrb[38].mxu0  ;;  %v695_v38 = vpop.f32.mrb[38].mxu1 }
 0x1b8   : > { %v536_v39 = vadd.f32 %v1562_v49, %v535_v37  ;;  %v696_v40 = vadd.f32 %v1562_v49, %v695_v38  ;;  %v537_v41 = vpop.f32.mrb[39].mxu0  ;;  %v697_v42 = vpop.f32.mrb[39].mxu1 }
 0x1ba   : > { %778 = vst [vmem:[%s1566_s25 + $0x98] sm:$0xff] %v536_v39  ;;  %810 = vst [vmem:[%s1566_s25 + $0x198] sm:$0xff] %v696_v40 }
 0x1bb   : > { %v540_v43 = vpop.f32.mrb[40].mxu0  ;;  %v700_v44 = vpop.f32.mrb[40].mxu1 }
 0x1bc   : > { %v541_v45 = vadd.f32 %v1562_v49, %v540_v43  ;;  %v701_v46 = vadd.f32 %v1562_v49, %v700_v44  ;;  %v542_v47 = vpop.f32.mrb[41].mxu0  ;;  %v702_v48 = vpop.f32.mrb[41].mxu1 }
 0x1be   : > { %779 = vst [vmem:[%s1566_s25 + $0xa0] sm:$0xff] %v541_v45  ;;  %811 = vst [vmem:[%s1566_s25 + $0x1a0] sm:$0xff] %v701_v46 }
 0x1bf   : > { %v545_v50 = vpop.f32.mrb[42].mxu0  ;;  %v705_v51 = vpop.f32.mrb[42].mxu1 }
 0x1c0   : > { %v546_v52 = vadd.f32 %v1562_v49, %v545_v50  ;;  %v706_v53 = vadd.f32 %v1562_v49, %v705_v51  ;;  %v547_v54 = vpop.f32.mrb[43].mxu0  ;;  %v707_v55 = vpop.f32.mrb[43].mxu1 }
 0x1c2   : > { %780 = vst [vmem:[%s1566_s25 + $0xa8] sm:$0xff] %v546_v52  ;;  %812 = vst [vmem:[%s1566_s25 + $0x1a8] sm:$0xff] %v706_v53 }
 0x1c3   : > { %v550_v56 = vpop.f32.mrb[44].mxu0  ;;  %v710_v57 = vpop.f32.mrb[44].mxu1 }
 0x1c4   : > { %v551_v58 = vadd.f32 %v1562_v49, %v550_v56  ;;  %v711_v59 = vadd.f32 %v1562_v49, %v710_v57  ;;  %v552_v60 = vpop.f32.mrb[45].mxu0  ;;  %v712_v61 = vpop.f32.mrb[45].mxu1 }
 0x1c6   : > { %781 = vst [vmem:[%s1566_s25 + $0xb0] sm:$0xff] %v551_v58  ;;  %813 = vst [vmem:[%s1566_s25 + $0x1b0] sm:$0xff] %v711_v59 }
 0x1c7   : > { %v555_v62 = vpop.f32.mrb[46].mxu0  ;;  %v715_v63 = vpop.f32.mrb[46].mxu1 }
 0x1c8   : > { %v556_v0 = vadd.f32 %v1562_v49, %v555_v62  ;;  %v716_v1 = vadd.f32 %v1562_v49, %v715_v63  ;;  %v557_v2 = vpop.f32.mrb[47].mxu0  ;;  %v717_v3 = vpop.f32.mrb[47].mxu1 }
 0x1ca   : > { %782 = vst [vmem:[%s1566_s25 + $0xb8] sm:$0xff] %v556_v0  ;;  %814 = vst [vmem:[%s1566_s25 + $0x1b8] sm:$0xff] %v716_v1 }
 0x1cb   : > { %v560_v4 = vpop.f32.mrb[48].mxu0  ;;  %v720_v5 = vpop.f32.mrb[48].mxu1 }
 0x1cc   : > { %v561_v6 = vadd.f32 %v1562_v49, %v560_v4  ;;  %v721_v7 = vadd.f32 %v1562_v49, %v720_v5  ;;  %v562_v8 = vpop.f32.mrb[49].mxu0  ;;  %v722_v9 = vpop.f32.mrb[49].mxu1 }
 0x1ce   : > { %783 = vst [vmem:[%s1566_s25 + $0xc0] sm:$0xff] %v561_v6  ;;  %815 = vst [vmem:[%s1566_s25 + $0x1c0] sm:$0xff] %v721_v7 }
 0x1cf   : > { %v565_v10 = vpop.f32.mrb[50].mxu0  ;;  %v725_v11 = vpop.f32.mrb[50].mxu1 }
 0x1d0   : > { %v566_v12 = vadd.f32 %v1562_v49, %v565_v10  ;;  %v726_v13 = vadd.f32 %v1562_v49, %v725_v11  ;;  %v567_v14 = vpop.f32.mrb[51].mxu0  ;;  %v727_v15 = vpop.f32.mrb[51].mxu1 }
 0x1d2   : > { %784 = vst [vmem:[%s1566_s25 + $0xc8] sm:$0xff] %v566_v12  ;;  %816 = vst [vmem:[%s1566_s25 + $0x1c8] sm:$0xff] %v726_v13 }
 0x1d3   : > { %v570_v16 = vpop.f32.mrb[52].mxu0  ;;  %v730_v17 = vpop.f32.mrb[52].mxu1 }
 0x1d4   : > { %v571_v18 = vadd.f32 %v1562_v49, %v570_v16  ;;  %v731_v19 = vadd.f32 %v1562_v49, %v730_v17  ;;  %v572_v20 = vpop.f32.mrb[53].mxu0  ;;  %v732_v21 = vpop.f32.mrb[53].mxu1 }
 0x1d6   : > { %785 = vst [vmem:[%s1566_s25 + $0xd0] sm:$0xff] %v571_v18  ;;  %817 = vst [vmem:[%s1566_s25 + $0x1d0] sm:$0xff] %v731_v19 }
 0x1d7   : > { %v575_v22 = vpop.f32.mrb[54].mxu0  ;;  %v735_v23 = vpop.f32.mrb[54].mxu1 }
 0x1d8   : > { %v576_v24 = vadd.f32 %v1562_v49, %v575_v22  ;;  %v736_v25 = vadd.f32 %v1562_v49, %v735_v23  ;;  %v577_v26 = vpop.f32.mrb[55].mxu0  ;;  %v737_v27 = vpop.f32.mrb[55].mxu1 }
 0x1da   : > { %786 = vst [vmem:[%s1566_s25 + $0xd8] sm:$0xff] %v576_v24  ;;  %818 = vst [vmem:[%s1566_s25 + $0x1d8] sm:$0xff] %v736_v25 }
 0x1db   : > { %v580_v28 = vpop.f32.mrb[56].mxu0  ;;  %v740_v29 = vpop.f32.mrb[56].mxu1 }
 0x1dc   : > { %v581_v30 = vadd.f32 %v1562_v49, %v580_v28  ;;  %v741_v31 = vadd.f32 %v1562_v49, %v740_v29  ;;  %v582_v32 = vpop.f32.mrb[57].mxu0  ;;  %v742_v33 = vpop.f32.mrb[57].mxu1 }
 0x1de   : > { %787 = vst [vmem:[%s1566_s25 + $0xe0] sm:$0xff] %v581_v30  ;;  %819 = vst [vmem:[%s1566_s25 + $0x1e0] sm:$0xff] %v741_v31 }
 0x1df   : > { %v585_v34 = vpop.f32.mrb[58].mxu0  ;;  %v745_v35 = vpop.f32.mrb[58].mxu1 }
 0x1e0   : > { %v586_v36 = vadd.f32 %v1562_v49, %v585_v34  ;;  %v746_v37 = vadd.f32 %v1562_v49, %v745_v35  ;;  %v587_v38 = vpop.f32.mrb[59].mxu0  ;;  %v747_v39 = vpop.f32.mrb[59].mxu1 }
 0x1e2   : > { %788 = vst [vmem:[%s1566_s25 + $0xe8] sm:$0xff] %v586_v36  ;;  %820 = vst [vmem:[%s1566_s25 + $0x1e8] sm:$0xff] %v746_v37 }
 0x1e3   : > { %v590_v40 = vpop.f32.mrb[60].mxu0  ;;  %v750_v41 = vpop.f32.mrb[60].mxu1 }
 0x1e4   : > { %v591_v42 = vadd.f32 %v1562_v49, %v590_v40  ;;  %v751_v43 = vadd.f32 %v1562_v49, %v750_v41  ;;  %v592_v44 = vpop.f32.mrb[61].mxu0  ;;  %v752_v45 = vpop.f32.mrb[61].mxu1 }
 0x1e6   : > { %789 = vst [vmem:[%s1566_s25 + $0xf0] sm:$0xff] %v591_v42  ;;  %821 = vst [vmem:[%s1566_s25 + $0x1f0] sm:$0xff] %v751_v43 }
 0x1e7   : > { %v595_v46 = vpop.f32.mrb[62].mxu0  ;;  %v755_v47 = vpop.f32.mrb[62].mxu1 }
 0x1e8   : > { %v596_v48 = vadd.f32 %v1562_v49, %v595_v46  ;;  %v756_v50 = vadd.f32 %v1562_v49, %v755_v47  ;;  %v597_v51 = vpop.f32.mrb[63].mxu0  ;;  %v757_v52 = vpop.f32.mrb[63].mxu1 }
 0x1ea   : > { %790 = vst [vmem:[%s1566_s25 + $0xf8] sm:$0xff] %v596_v48  ;;  %822 = vst [vmem:[%s1566_s25 + $0x1f8] sm:$0xff] %v756_v50 }
 0x1eb   : > { %1156 = shalt.err (!%p1153_p7)
}
 0x1ec   : > { %s1157_s22 = scalar_lea.hbm %s1695_s27, 8192  ;;  %s1161_s9 = scalar_lea.hbm %s1748_s3, 16384 }
 0x1ed   : > { %p1158_p9 = scmp.ne.s32.totalorder %s1695_s27, %s1157_s22  ;;  %p1162_p5 = scmp.lt.u32.totalorder %s1695_s27, %s1748_s3 }
 0x1ee   : > { %p1163_p11 = scmp.lt.u32.totalorder %s1161_s9, %s1157_s22  ;;  %p1165_p4 = scmp.lt.u32.totalorder %s1157_s22, %s1695_s27 }
 0x1ef   : > { %p1159_p2 = pnand %p1158_p9, %p1336_p12 }
 0x1f0   : > { %p1164_p1 = por %p1163_p11, %p1162_p5 }
 0x1f1   : > { %p1160_p0 = pneg %p1159_p2 }
 0x1f2   : > { %p1166_p6 = por %p1165_p4, %p1164_p1 }
 0x1f4   : > { %p1167_p8 = pnand %p1166_p6, %p1160_p0 }
 0x1f6   : > { %1170 = shalt.err (!%p1167_p8)
}
 0x1f7   : > { %s1223_s4 = smov 128   ;;  %s1224_s25 = smov 8  }
 0x1f8   : > { %1027 = dma.vmem_to_hbm [thread:$0]  (%p1336_p12), %s1697_s5, 8192, %s1695_s27, %s824_s16, %s1223_s4, %s1223_s4, %s1224_s25  }
 0x1f9 PF: > { %s852_s26 = sand.u32 1, %s1201_s12   ;;  %p1763_p10 = scmp.ne.s32.totalorder %s1753_s19, 0 }
 0x1fa   : > { %p1764_p13 = scmp.ge.s32.totalorder %s1213_s15, 2  ;;  %s853_s10 = scalar_lea.sflag [#allocation4], %s852_s26 }
 0x1fc   : > { %p1038_p3 = pnand %p1764_p13, %p1763_p10 }
 0x1fe   : > { %1196 = dma.done.wait (!%p1038_p3), %s853_s10, 8192  }
 0x1ff   : > { %1198 = vsyncadd (!%p1038_p3), %s853_s10, 4294959104  ;;  %p17_p7 = scmp.ge.s32.totalorder %s1301_s24, 4   ;;  %s1765_s12 = smov %s1205_s13 }
 0x200   : > { %s1766_s13 = smov %s1209_s14  ;;  %s1767_s14 = smov %s1332_s17 }
 0x201   : > { %s1768_s15 = smov %s1301_s24  ;;  %19 = sbr.rel (!%p17_p7) target bundleno = 6 (0x6), region = 81 }
 0x208   :  { %858 = vsyncpa [#allocation3], 1 }
 0x209   :  { %860 = vsyncpa [#allocation3 + $0x1], 1 }
 0x20a   :  { %861 = vsyncpa [#allocation6], 1 }
 0x20b   :  { %862 = vsyncpa [#allocation4], 1 }
 0x20c   :  { %864 = vsyncpa [#allocation4 + $0x1], 1 }

</bundles_post_ra>
